<compile_context>
chip_gen: v6e
topology: v6e:2x2x1
jax: 0.10.0
libtpu: 0.0.40
codegen_flags: <defaults>
</compile_context>

<pallas_src>
import functools

import jax
import jax.numpy as jnp
from jax.experimental import pallas as pl
from jax.experimental.pallas import tpu as pltpu

_MIB = 1024 * 1024


def _round_up(x, m):
    return ((x + m - 1) // m) * m


def _vmem_capacity_bytes():
    """Per-core VMEM capacity; used to pick tiles / clamp the VMEM limit per generation."""
    try:
        info = pltpu.get_tpu_info()
        cap = getattr(info, "vmem_capacity_bytes", None)
        if cap:
            return int(cap)
    except Exception:
        pass
    try:
        kind = jax.devices()[0].device_kind.lower()
        if "v7" in kind:
            return 64 * _MIB
    except Exception:
        pass
    return 128 * _MIB  # v5e / v6e default


def _mptglu_kernel(x_ref, wgu_ref, bgu_ref, wd_ref, bd_ref, o_ref, acc_ref, *, tf,
                   precision):
    """One (M-tile, ffn-tile) step of down(gelu(gate(x)) * up(x)) with a fused gate|up matmul."""
    k = pl.program_id(1)

    @pl.when(k == 0)
    def _():
        acc_ref[...] = jnp.zeros_like(acc_ref)

    # Native-dtype MXU inputs (bf16 fast path), f32 accumulation.
    x = x_ref[...]
    gu = jnp.dot(x, wgu_ref[...], preferred_element_type=jnp.float32,
                 precision=precision)
    gu = gu + bgu_ref[...].astype(jnp.float32)

    # Lane-aligned static split (tf is a multiple of 128) of the fused [gate | up] result.
    gate = gu[:, :tf]
    up = gu[:, tf:]

    # Exact GELU (torch.nn.functional.gelu, approximate='none'); EUP/VPU work rides under
    # MXU slack at these tile sizes.
    inv_sqrt2 = jnp.float32(0.7071067811865476)
    gate_act = 0.5 * gate * (1.0 + jax.lax.erf(gate * inv_sqrt2))

    h = (gate_act * up).astype(wd_ref.dtype)
    acc_ref[...] += jnp.dot(h, wd_ref[...], preferred_element_type=jnp.float32,
                            precision=precision)

    @pl.when(k == pl.num_programs(1) - 1)
    def _():
        out = acc_ref[...] + bd_ref[...].astype(jnp.float32)
        o_ref[...] = out.astype(o_ref.dtype)


def mptglu_forward(x, wg, bg, wu, bu, wd, bd, *, tile_m=None, tile_f=None,
                   vmem_limit_bytes=None, precision=None):
    """x: [B, S, d_model]; wg/wu: [d_model, ffn]; wd: [ffn, d_model]; biases 1-D.

    precision: optional lax.Precision for the MXU matmuls (e.g. HIGHEST for bit-level
    f32 fidelity vs the torch fp32 reference); default uses the TPU fast path.
    """
    B, S, d_model = x.shape
    ffn = wg.shape[1]
    M = B * S

    a_bytes = jnp.dtype(x.dtype).itemsize
    w_bytes = jnp.dtype(wg.dtype).itemsize
    sub = 16 if a_bytes == 2 else 8

    vmem_cap = _vmem_capacity_bytes()
    small_vmem = vmem_cap <= 64 * _MIB  # v7x-like: 64 MiB/TC, 2 TCs per chip

    # ---- generation-aware defaults (intensity ≈ tm FLOP / weight byte).
    if tile_m is None:
        tile_m = 512 if small_vmem else 1024
    if tile_f is None:
        tile_f = 512

    # ---- ffn tiling: tf multiple of 128 (prefer multiples of 256 for the 256x256 MXU);
    #      ffn is zero-padded up to a multiple of tf so no tf=ffn fallback is ever needed.
    tf = max(128, (tile_f // 128) * 128)
    if tf >= 256:
        tf = (tf // 256) * 256
    tf = min(tf, _round_up(ffn, 128))
    ffn_pad = _round_up(ffn, tf)

    # ---- M tiling: large tile, multiple of the dtype sublane tile.
    tm = min(_round_up(tile_m, sub), _round_up(M, sub))

    # ---- VMEM fit check (double-buffered streams + f32 accumulator + elementwise temps).
    def _need(tm_, tf_):
        per_stream = (
            tm_ * d_model * a_bytes            # x tile
            + d_model * 2 * tf_ * w_bytes      # fused W_gate|W_up slab
            + tf_ * d_model * w_bytes          # W_down slab
            + 8 * (2 * tf_ + d_model) * w_bytes  # bias slabs (sublane-padded)
            + tm_ * d_model * a_bytes          # output tile
        )
        temps = 16 * tm_ * tf_                 # gu / gate_act f32 + h temporaries
        return 2 * per_stream + tm_ * d_model * 4 + temps

    budget = int(vmem_cap * 0.8)
    # Prefer cutting tf (MXU fill / k-step count) before tm (HBM weight re-streams).
    while _need(tm, tf) > budget:
        if tf > 256:
            tf = 256
            ffn_pad = _round_up(ffn, tf)
        elif tm > max(256, sub):
            tm = max(sub, _round_up(tm // 2, sub))
        elif tf > 128:
            tf = 128
            ffn_pad = _round_up(ffn, tf)
        elif tm > sub:
            tm = max(sub, _round_up(tm // 2, sub))
        else:
            break

    # ---- on 2-TC parts, make sure the "parallel" M axis has >=2 tiles to shard.
    if small_vmem and _round_up(M, tm) // tm < 2 and M > sub:
        tm = max(sub, _round_up(-(-M // 2), sub))

    m_pad = _round_up(M, tm)

    # ---- activation prep (pad only the ragged remainder; TODO: could be replaced by a
    #      masked last tile to avoid the HBM copy for ragged M — few-% on large M).
    x2d = x.reshape(M, d_model)
    if m_pad != M:
        x2d = jnp.pad(x2d, ((0, m_pad - M), (0, 0)))

    # ---- weight prep: zero-pad ffn to ffn_pad, fuse gate|up per k-slab (hoist in prod).
    pad_f = ffn_pad - ffn
    if pad_f:
        wg = jnp.pad(wg, ((0, 0), (0, pad_f)))
        wu = jnp.pad(wu, ((0, 0), (0, pad_f)))
        bg = jnp.pad(bg, (0, pad_f))
        bu = jnp.pad(bu, (0, pad_f))
        wd = jnp.pad(wd, ((0, pad_f), (0, 0)))
    nk = ffn_pad // tf
    wgu = jnp.concatenate(
        [wg.reshape(d_model, nk, tf), wu.reshape(d_model, nk, tf)], axis=2
    ).reshape(d_model, nk * 2 * tf)
    bgu = jnp.concatenate(
        [bg.reshape(nk, tf), bu.reshape(nk, tf)], axis=1
    ).reshape(1, nk * 2 * tf)
    bd2d = bd.reshape(1, d_model)

    grid = (m_pad // tm, nk)

    # ---- per-generation VMEM limit clamp (never above physical capacity).
    if vmem_limit_bytes is None:
        if small_vmem:
            cap_limit = min(56 * _MIB, vmem_cap - 8 * _MIB)
        else:
            cap_limit = min(100 * _MIB, vmem_cap - 16 * _MIB)
        vmem_limit_bytes = int(min(max(_need(tm, tf) * 5 // 4, 32 * _MIB), cap_limit))
        vmem_limit_bytes = max(vmem_limit_bytes, 16 * _MIB)

    # ---- advisory cost estimate (x is DMA'd once per M tile; weights re-streamed per M tile).
    num_m_tiles = m_pad // tm
    cost = pl.CostEstimate(
        flops=6 * M * d_model * ffn,
        transcendentals=M * ffn,
        bytes_accessed=(
            m_pad * d_model * a_bytes                          # x, once per M tile
            + 3 * d_model * ffn_pad * w_bytes * num_m_tiles    # weight streams
            + (2 * ffn_pad + d_model) * w_bytes * num_m_tiles  # bias streams
            + M * d_model * a_bytes                            # output
        ),
    )

    kernel = functools.partial(_mptglu_kernel, tf=tf, precision=precision)

    out2d = pl.pallas_call(
        kernel,
        out_shape=jax.ShapeDtypeStruct((m_pad, d_model), x.dtype),
        grid_spec=pltpu.PrefetchScalarGridSpec(
            num_scalar_prefetch=0,
            grid=grid,
            in_specs=[
                pl.BlockSpec((tm, d_model), lambda i, k: (i, 0)),      # x tile
                pl.BlockSpec((d_model, 2 * tf), lambda i, k: (0, k)),  # fused W_gate|W_up slab
                pl.BlockSpec((1, 2 * tf), lambda i, k: (0, k)),        # fused bias slab
                pl.BlockSpec((tf, d_model), lambda i, k: (k, 0)),      # W_down slab
                pl.BlockSpec((1, d_model), lambda i, k: (0, 0)),       # b_down
            ],
            out_specs=pl.BlockSpec((tm, d_model), lambda i, k: (i, 0)),
            scratch_shapes=[pltpu.VMEM((tm, d_model), jnp.float32)],
        ),
        compiler_params=pltpu.CompilerParams(
            dimension_semantics=("parallel", "arbitrary"),
            vmem_limit_bytes=vmem_limit_bytes,
        ),
        cost_estimate=cost,
    )(x2d, wgu, bgu, wd, bd2d)

    return out2d[:M].reshape(B, S, d_model)


def reference_forward(x, wg, bg, wu, bu, wd, bd):
    xf = x.astype(jnp.float32)
    wgf, bgf = wg.astype(jnp.float32), bg.astype(jnp.float32)
    wuf, buf = wu.astype(jnp.float32), bu.astype(jnp.float32)
    wdf, bdf = wd.astype(jnp.float32), bd.astype(jnp.float32)
    gate = xf @ wgf + bgf
    up = xf @ wuf + buf
    gate_act = 0.5 * gate * (1.0 + jax.lax.erf(gate / jnp.sqrt(2.0)))
    h = gate_act * up
    return (h @ wdf + bdf).astype(x.dtype)


def _make_params(key, d_model, ffn, dtype):
    kg, kbg, ku, kbu, kd, kbd = jax.random.split(key, 6)
    s_in = 1.0 / jnp.sqrt(jnp.float32(d_model))
    s_ffn = 1.0 / jnp.sqrt(jnp.float32(ffn))
    wg = jax.random.uniform(kg, (d_model, ffn), jnp.float32, -s_in, s_in).astype(dtype)
    bg = jax.random.uniform(kbg, (ffn,), jnp.float32, -s_in, s_in).astype(dtype)
    wu = jax.random.uniform(ku, (d_model, ffn), jnp.float32, -s_in, s_in).astype(dtype)
    bu = jax.random.uniform(kbu, (ffn,), jnp.float32, -s_in, s_in).astype(dtype)
    wd = jax.random.uniform(kd, (ffn, d_model), jnp.float32, -s_ffn, s_ffn).astype(dtype)
    bd = jax.random.uniform(kbd, (d_model,), jnp.float32, -s_ffn, s_ffn).astype(dtype)
    return wg, bg, wu, bu, wd, bd


if __name__ == "__main__":
    key = jax.random.PRNGKey(0)

    # --- Test 1: module toy config (d_model=32, expansion_ratio=4, bias=True), f32,
    #             auto tiling (single k-step, fused gate/up matmul).
    d_model, ffn = 32, 32 * 4
    B, S = 2, 8
    k1, k2 = jax.random.split(key)
    x = jax.random.normal(k1, (B, S, d_model), dtype=jnp.float32)
    params = _make_params(k2, d_model, ffn, jnp.float32)
    out = jax.block_until_ready(mptglu_forward(x, *params))
    ref = reference_forward(x, *params)
    assert out.shape == (B, S, d_model)
    assert jnp.allclose(out, ref, atol=1e-5, rtol=1e-5), "f32 toy mismatch"

    # --- Test 2: multi-tile path: ragged M (padded), ffn not a multiple of tf (ffn
    #             zero-padded), multiple k-steps on the accumulator.
    d_model, ffn = 128, 320
    B, S = 3, 17  # M = 51 -> padded
    k3, k4 = jax.random.split(k2)
    x2 = jax.random.normal(k3, (B, S, d_model), dtype=jnp.float32)
    params2 = _make_params(k4, d_model, ffn, jnp.float32)
    out2 = jax.block_until_ready(
        mptglu_forward(x2, *params2, tile_m=16, tile_f=256))
    ref2 = reference_forward(x2, *params2)
    assert out2.shape == (B, S, d_model)
    assert jnp.allclose(out2, ref2, atol=1e-4, rtol=1e-4), "f32 tiled/padded mismatch"

    # --- Test 3: bf16 fast path (bf16 MXU inputs, f32 accumulation), multi k-step.
    d_model, ffn = 128, 512
    k5, k6 = jax.random.split(k4)
    x3 = jax.random.normal(k5, (B, S, d_model), dtype=jnp.bfloat16)
    params3 = _make_params(k6, d_model, ffn, jnp.bfloat16)
    out3 = jax.block_until_ready(
        mptglu_forward(x3, *params3, tile_m=64, tile_f=256))
    ref3 = reference_forward(x3, *params3)
    assert out3.shape == (B, S, d_model)
    assert jnp.allclose(out3.astype(jnp.float32), ref3.astype(jnp.float32),
                        atol=3e-2, rtol=3e-2), "bf16 mismatch"

    print("KERNEL_OK")
</pallas_src>

<mosaic_0001>
module attributes {stable_mosaic.version = 11 : i64} {
  func.func @_mptglu_kernel(%arg0: i32, %arg1: i32, %arg2: memref<16x32xf32, #tpu.memory_space<vmem>>, %arg3: memref<32x256xf32, #tpu.memory_space<vmem>>, %arg4: memref<1x256xf32, #tpu.memory_space<vmem>>, %arg5: memref<128x32xf32, #tpu.memory_space<vmem>>, %arg6: memref<1x32xf32, #tpu.memory_space<vmem>>, %arg7: memref<16x32xf32, #tpu.memory_space<vmem>>, %arg8: memref<16x32xf32, #tpu.memory_space<vmem>>) attributes {dimension_semantics = [#tpu.dimension_semantics<parallel>, #tpu.dimension_semantics<arbitrary>], iteration_bounds = array<i64: 1, 1>, scalar_prefetch = 0 : i64, scratch_operands = 1 : i64, tpu.core_type = #tpu.core_type<tc>, window_params = [{transform_indices = @transform_0, window_bounds = array<i64: 16, 32>}, {transform_indices = @transform_1, window_bounds = array<i64: 32, 256>}, {transform_indices = @transform_2, window_bounds = array<i64: 1, 256>}, {transform_indices = @transform_3, window_bounds = array<i64: 128, 32>}, {pipeline_mode = #tpu.pipeline_mode<synchronous>, transform_indices = @transform_4, window_bounds = array<i64: 1, 32>}, {transform_indices = @transform_5, window_bounds = array<i64: 16, 32>}]} {
    %c0_i32 = arith.constant 0 : i32
    %0 = arith.cmpi eq, %arg1, %c0_i32 : i32
    %1 = arith.extui %0 : i1 to i32
    %c0_i32_0 = arith.constant 0 : i32
    %2 = arith.cmpi ne, %1, %c0_i32_0 : i32
    scf.if %2 {
      %cst_18 = arith.constant 0.000000e+00 : f32
      %28 = vector.broadcast %cst_18 : f32 to vector<16x32xf32>
      %c0_19 = arith.constant 0 : index
      %c0_20 = arith.constant 0 : index
      %29 = vector.load %arg8[%c0_19, %c0_20] : memref<16x32xf32, #tpu.memory_space<vmem>>, vector<16x32xf32>
      tpu.vector_store %arg8[%c0_19, %c0_20], %28 {strides = array<i32>} : memref<16x32xf32, #tpu.memory_space<vmem>>, vector<16x32xf32>,
    } else {
    }
    %c0 = arith.constant 0 : index
    %c0_1 = arith.constant 0 : index
    %3 = vector.load %arg2[%c0, %c0_1] : memref<16x32xf32, #tpu.memory_space<vmem>>, vector<16x32xf32>
    %c0_2 = arith.constant 0 : index
    %c0_3 = arith.constant 0 : index
    %4 = vector.load %arg3[%c0_2, %c0_3] : memref<32x256xf32, #tpu.memory_space<vmem>>, vector<32x256xf32>
    %cst = arith.constant dense<0.000000e+00> : vector<16x256xf32>
    %5 = tpu.matmul %3, %4, %cst {dimension_numbers = #tpu.dot_dimension_numbers<[1], [0], [0], [1], [0, 0, 1, 1], [], []>} : vector<16x32xf32>, vector<32x256xf32>, vector<16x256xf32> -> vector<16x256xf32>
    %c0_4 = arith.constant 0 : index
    %c0_5 = arith.constant 0 : index
    %6 = vector.load %arg4[%c0_4, %c0_5] : memref<1x256xf32, #tpu.memory_space<vmem>>, vector<1x256xf32>
    %7 = vector.broadcast %6 : vector<1x256xf32> to vector<16x256xf32>
    %8 = arith.addf %5, %7 : vector<16x256xf32>
    %9 = vector.extract_strided_slice %8 {offsets = [0, 0], sizes = [16, 128], strides = [1, 1]} : vector<16x256xf32> to vector<16x128xf32>
    %10 = vector.extract_strided_slice %8 {offsets = [0, 128], sizes = [16, 128], strides = [1, 1]} : vector<16x256xf32> to vector<16x128xf32>
    %cst_6 = arith.constant 5.000000e-01 : f32
    %11 = vector.broadcast %cst_6 : f32 to vector<16x128xf32>
    %12 = arith.mulf %11, %9 : vector<16x128xf32>
    %cst_7 = arith.constant 0.707106769 : f32
    %13 = vector.broadcast %cst_7 : f32 to vector<16x128xf32>
    %14 = arith.mulf %9, %13 : vector<16x128xf32>
    %15 = math.erf %14 : vector<16x128xf32>
    %cst_8 = arith.constant 1.000000e+00 : f32
    %16 = vector.broadcast %cst_8 : f32 to vector<16x128xf32>
    %17 = arith.addf %16, %15 : vector<16x128xf32>
    %18 = arith.mulf %12, %17 : vector<16x128xf32>
    %19 = arith.mulf %18, %10 : vector<16x128xf32>
    %c0_9 = arith.constant 0 : index
    %c0_10 = arith.constant 0 : index
    %20 = vector.load %arg8[%c0_9, %c0_10] : memref<16x32xf32, #tpu.memory_space<vmem>>, vector<16x32xf32>
    %c0_11 = arith.constant 0 : index
    %c0_12 = arith.constant 0 : index
    %21 = vector.load %arg5[%c0_11, %c0_12] : memref<128x32xf32, #tpu.memory_space<vmem>>, vector<128x32xf32>
    %cst_13 = arith.constant dense<0.000000e+00> : vector<16x32xf32>
    %22 = tpu.matmul %19, %21, %cst_13 {dimension_numbers = #tpu.dot_dimension_numbers<[1], [0], [0], [1], [0, 0, 1, 1], [], []>} : vector<16x128xf32>, vector<128x32xf32>, vector<16x32xf32> -> vector<16x32xf32>
    %23 = arith.addf %20, %22 : vector<16x32xf32>
    %c0_14 = arith.constant 0 : index
    %c0_15 = arith.constant 0 : index
    %24 = vector.load %arg8[%c0_14, %c0_15] : memref<16x32xf32, #tpu.memory_space<vmem>>, vector<16x32xf32>
    tpu.vector_store %arg8[%c0_14, %c0_15], %23 {strides = array<i32>} : memref<16x32xf32, #tpu.memory_space<vmem>>, vector<16x32xf32>,
    %c0_i32_16 = arith.constant 0 : i32
    %25 = arith.cmpi eq, %arg1, %c0_i32_16 : i32
    %26 = arith.extui %25 : i1 to i32
    %c0_i32_17 = arith.constant 0 : i32
    %27 = arith.cmpi ne, %26, %c0_i32_17 : i32
    scf.if %27 {
      %c0_18 = arith.constant 0 : index
      %c0_19 = arith.constant 0 : index
      %28 = vector.load %arg8[%c0_18, %c0_19] : memref<16x32xf32, #tpu.memory_space<vmem>>, vector<16x32xf32>
      %c0_20 = arith.constant 0 : index
      %c0_21 = arith.constant 0 : index
      %29 = vector.load %arg6[%c0_20, %c0_21] : memref<1x32xf32, #tpu.memory_space<vmem>>, vector<1x32xf32>
      %30 = vector.broadcast %29 : vector<1x32xf32> to vector<16x32xf32>
      %31 = arith.addf %28, %30 : vector<16x32xf32>
      %c0_22 = arith.constant 0 : index
      %c0_23 = arith.constant 0 : index
      %32 = vector.load %arg7[%c0_22, %c0_23] : memref<16x32xf32, #tpu.memory_space<vmem>>, vector<16x32xf32>
      tpu.vector_store %arg7[%c0_22, %c0_23], %31 {strides = array<i32>} : memref<16x32xf32, #tpu.memory_space<vmem>>, vector<16x32xf32>,
    } else {
    }
    return
  }
  func.func @transform_0(%arg0: i32, %arg1: i32) -> (i32, i32) {
    %c0_i32 = arith.constant 0 : i32
    %c0_i32_0 = arith.constant 0 : i32
    return %arg0, %c0_i32 : i32, i32
  }
  func.func @transform_1(%arg0: i32, %arg1: i32) -> (i32, i32) {
    %c0_i32 = arith.constant 0 : i32
    %c0_i32_0 = arith.constant 0 : i32
    return %c0_i32, %arg1 : i32, i32
  }
  func.func @transform_2(%arg0: i32, %arg1: i32) -> (i32, i32) {
    %c0_i32 = arith.constant 0 : i32
    %c0_i32_0 = arith.constant 0 : i32
    return %c0_i32, %arg1 : i32, i32
  }
  func.func @transform_3(%arg0: i32, %arg1: i32) -> (i32, i32) {
    %c0_i32 = arith.constant 0 : i32
    %c0_i32_0 = arith.constant 0 : i32
    return %arg1, %c0_i32 : i32, i32
  }
  func.func @transform_4(%arg0: i32, %arg1: i32) -> (i32, i32) {
    %c0_i32 = arith.constant 0 : i32
    %c0_i32_0 = arith.constant 0 : i32
    %c0_i32_1 = arith.constant 0 : i32
    return %c0_i32, %c0_i32_0 : i32, i32
  }
  func.func @transform_5(%arg0: i32, %arg1: i32) -> (i32, i32) {
    %c0_i32 = arith.constant 0 : i32
    %c0_i32_0 = arith.constant 0 : i32
    return %arg0, %c0_i32 : i32, i32
  }
}

</mosaic_0001>

<bundles_post_ra>
// kernel: tpu_custom_call.1
= control target key start
LH: loop header
LB: loop body
LE: loop exit
PB: predicated region body
PF: predicated region fallthrough
CT: control target
= control target key end

     0   :  { %vm25_vm0 = vcmask 261120   ;;  %v361_v4 = vmov 0.0   ;;  %s490_s0 = inlined_call_operand.vmem [shape: f32[16,32], index: 0, kind: input, shape index: {}]   ;;  %s491_s1 = inlined_call_operand.vmem [shape: f32[32,256], index: 1, kind: input, shape index: {}]   ;;  %s492_s2 = inlined_call_operand.vmem [shape: f32[1,256], index: 2, kind: input, shape index: {}]   ;;  %s493_s3 = inlined_call_operand.vmem [shape: f32[128,32], index: 3, kind: input, shape index: {}]   ;;  %s494_s4 = inlined_call_operand.vmem [shape: f32[1,32], index: 4, kind: input, shape index: {}]   ;;  %s495_s5 = inlined_call_operand.hbm [shape: f32[16,32], index: 5, kind: output, shape index: {}]  }
   0x1   :  { %v37_v0 = vld [vmem:[%s491_s1 + $0x38] sm:$0xff]  ;;  %v36_v1 = vld [vmem:[%s491_s1 + $0x30] sm:$0xff]  ;;  %v35_v2 = vld [vmem:[%s491_s1 + $0x28] sm:$0xff]  ;;  %26 = vst.msk [vmem:[#allocation2] sm:$0xff] %vm25_vm0, %v361_v4  ;;  %121 = vmatprep.mubr.f32.mxu0 %v361_v4 }
   0x2   :  { %81 = vmatprep.subr.mxu0 %v37_v0  ;;  %v34_v3 = vld [vmem:[%s491_s1 + $0x20] sm:$0xff]  ;;  %27 = vst.msk [vmem:[#allocation2 + $0x8] sm:$0xff] %vm25_vm0, %v361_v4  ;;  %v33_v5 = vld [vmem:[%s491_s1 + $0x18] sm:$0xff]  ;;  %v32_v6 = vld [vmem:[%s491_s1 + $0x10] sm:$0xff] }
   0x3   :  { %82 = vmatpush1.msra.mxu0 %v36_v1  ;;  %v163_v7 = vld [vmem:[%s493_s3 + $0x78] sm:$0xff]  ;;  %v162_v8 = vld [vmem:[%s493_s3 + $0x70] sm:$0xff]  ;;  %v31_v9 = vld [vmem:[%s491_s1 + $0x8] sm:$0xff] }
   0x4   :  { %83 = vmatprep.subr.mxu0 %v35_v2  ;;  %296 = vmatprep.subr.mxu1 %v163_v7 }
   0x5   :  { %84 = vmatpush1.msra.mxu0 %v34_v3 }
   0x6   :  { %10 = vsyncpa [#allocation4], 0  ;;  %85 = vmatprep.subr.mxu0 %v33_v5  ;;  %v30_v10 = vld [vmem:[%s491_s1] sm:$0xff]  ;;  %297 = vmatpush3.msra.mxu1 %v163_v7  ;;  %v29_v12 = vld [vmem:[%s490_s0 + $0x8] sm:$0xff]  ;;  %v40_v27 = vlaneseq  ;;  %s362_s19 = smov [#allocation3]  }
   0x7   :  { %86 = vmatpush1.msra.mxu0 %v32_v6  ;;  %v28_v11 = vld [vmem:[%s490_s0] sm:$0xff]  ;;  %298 = vmatprep.subr.mxu1 %v162_v8  ;;  %v161_v13 = vld [vmem:[%s493_s3 + $0x68] sm:$0xff]  ;;  %v159_v15 = vld [vmem:[%s493_s3 + $0x58] sm:$0xff]  ;;  %s264_s20 = sshll.u32 %s362_s19, 4  ;;  %s265_s20 = int_to_ptr.vmem [resolvable:$true] %s264_s20 }
   0x8   :  { %87 = vmatprep.subr.mxu0 %v31_v9  ;;  %299 = vmatpush3.msra.mxu1 %v162_v8  ;;  %v160_v14 = vld [vmem:[%s493_s3 + $0x60] sm:$0xff]  ;;  %v158_v16 = vld [vmem:[%s493_s3 + $0x50] sm:$0xff]  ;;  %v157_v17 = vld [vmem:[%s493_s3 + $0x48] sm:$0xff]  ;;  %v41_v28 = vshrl.u32 %v40_v27, 7  ;;  %s339_s21 = scalar_lea.vmem %s265_s20, 256  ;;  %p344_p1 = scmp.lt.s32.totalorder %s265_s20, %s265_s20 }
   0x9   :  { %88 = vmatpush1.msra.mxu0 %v30_v10  ;;  %300 = vmatprep.subr.mxu1 %v161_v13  ;;  %v156_v18 = vld [vmem:[%s493_s3 + $0x40] sm:$0xff]  ;;  %v155_v19 = vld [vmem:[%s493_s3 + $0x38] sm:$0xff]  ;;  %v154_v20 = vld [vmem:[%s493_s3 + $0x30] sm:$0xff]  ;;  %p340_p0 = scmp.ne.s32.totalorder %s265_s20, %s339_s21  ;;  %p345_p2 = scmp.lt.s32.totalorder %s339_s21, %s339_s21 }
   0xa   :  { %275 = vmatmul.mubr.msk.f32.vlgmr.msra.gmra.mxu0 %vm25_vm0, %v28_v11  ;;  %301 = vmatpush3.msra.mxu1 %v161_v13  ;;  %v153_v21 = vld [vmem:[%s493_s3 + $0x28] sm:$0xff]  ;;  %v152_v22 = vld [vmem:[%s493_s3 + $0x20] sm:$0xff]  ;;  %v151_v23 = vld [vmem:[%s493_s3 + $0x18] sm:$0xff]  ;;  %v42_v29 = vsub.s32 0, %v41_v28  ;;  %v46_v39 = vsub.s32 1, %v41_v28 }
   0xb   :  { %127 = vmatprep.mubr.f32.mxu0 %v361_v4  ;;  %302 = vmatprep.subr.mxu1 %v160_v14  ;;  %v150_v24 = vld [vmem:[%s493_s3 + $0x10] sm:$0xff]  ;;  %v149_v25 = vld [vmem:[%s493_s3 + $0x8] sm:$0xff]  ;;  %v148_v26 = vld [vmem:[%s493_s3] sm:$0xff]  ;;  %p346_p3 = por %p345_p2, %p344_p1 }
   0xc   :  { %303 = vmatpush3.msra.mxu1 %v160_v14  ;;  %v38_v30 = vld [vmem:[%s492_s2] sm:$0x3]  ;;  %v147_v54 = vld [vmem:[#allocation2 + $0x8] sm:$0xff] }
   0xd   :  { %304 = vmatprep.subr.mxu1 %v159_v15  ;;  %v43_v31 = vrot.slane %v38_v30, %v42_v29  ;;  %v47_v40 = vrot.slane %v38_v30, %v46_v39  ;;  %v146_v56 = vld [vmem:[#allocation2] sm:$0xff]  ;;  %p347_p4 = pnand %p346_p3, %p340_p0 }
   0xe   :  { %276 = vmatmul.mubr.msk.f32.gmra.mxu0 %vm25_vm0, %v29_v12  ;;  %305 = vmatpush3.msra.mxu1 %v159_v15  ;;  %v277_v60 = vld [vmem:[%s494_s4] ss:$0 sm:$0xff] }
   0xf   :  { %306 = vmatprep.subr.mxu1 %v158_v16 }
  0x10   :  { %307 = vmatpush3.msra.mxu1 %v158_v16 }
  0x11   :  { %308 = vmatprep.subr.mxu1 %v157_v17 }
  0x12   :  { %309 = vmatpush3.msra.mxu1 %v157_v17 }
  0x13   :  { %310 = vmatprep.subr.mxu1 %v156_v18 }
  0x14   :  { %311 = vmatpush3.msra.mxu1 %v156_v18 }
  0x15   :  { %312 = vmatprep.subr.mxu1 %v155_v19 }
  0x16   :  { %313 = vmatpush3.msra.mxu1 %v155_v19 }
  0x17   :  { %314 = vmatprep.subr.mxu1 %v154_v20 }
  0x18   :  { %315 = vmatpush3.msra.mxu1 %v154_v20 }
  0x19   :  { %316 = vmatprep.subr.mxu1 %v153_v21 }
  0x1a   :  { %317 = vmatpush3.msra.mxu1 %v153_v21 }
  0x1b   :  { %318 = vmatprep.subr.mxu1 %v152_v22 }
  0x1c   :  { %319 = vmatpush3.msra.mxu1 %v152_v22 }
  0x1d   :  { %320 = vmatprep.subr.mxu1 %v151_v23 }
  0x1e   :  { %321 = vmatpush3.msra.mxu1 %v151_v23 }
  0x1f   :  { %322 = vmatprep.subr.mxu1 %v150_v24 }
  0x20   :  { %323 = vmatpush3.msra.mxu1 %v150_v24 }
  0x21   :  { %324 = vmatprep.subr.mxu1 %v149_v25 }
  0x22   :  { %325 = vmatpush3.msra.mxu1 %v149_v25 }
  0x23   :  { %326 = vmatprep.subr.mxu1 %v148_v26 }
  0x24   :  { %327 = vmatpush3.msra.mxu1 %v148_v26 }
  0xca   :  { %v123_v32 = vpop.f32.mrf.mxu0 }
  0xcb   :  { %v124_v33 = vadd.f32 %v123_v32, %v43_v31 }
  0xcc   :  { %v125_v34 = vpop.f32.mrf.mxu0 }
  0xcd   :  { %v136_v35 = vmul.f32 0.70710677, %v124_v33  ;;  %v134_v42 = vmul.f32 0.5, %v124_v33  ;;  %v126_v44 = vadd.f32 %v125_v34, %v47_v40 }
  0xce   :  { %v129_v36 = vpop.f32.mrf.mxu0 }
  0xcf   :  { %335 = verf.f32 %v136_v35  ;;  %v130_v37 = vadd.f32 %v129_v36, %v43_v31 }
  0xd0   :  { %v131_v47 = vpop.f32.mrf.mxu0 }
  0xd1   :  { %v137_v38 = vmul.f32 0.70710677, %v130_v37  ;;  %v135_v48 = vmul.f32 0.5, %v130_v37  ;;  %v132_v51 = vadd.f32 %v131_v47, %v47_v40 }
  0xd3   :  { %337 = verf.f32 %v137_v38 }
  0xdc   :  { %v336_v41 = vpop.eup %335 }
  0xdd   :  { %v140_v43 = vadd.f32 1.0, %v336_v41 }
  0xdf   :  { %v142_v45 = vmul.f32 %v140_v43, %v134_v42 }
  0xe0   :  { %v338_v46 = vpop.eup %337 }
  0xe1   :  { %v141_v49 = vadd.f32 1.0, %v338_v46  ;;  %v144_v50 = vmul.f32 %v142_v45, %v126_v44 }
  0xe3   :  { %v143_v52 = vmul.f32 %v141_v49, %v135_v48  ;;  %328 = vmatprep.mubr.f32.mxu1 %v144_v50 }
  0xe5   :  { %v145_v53 = vmul.f32 %v143_v52, %v132_v51 }
  0xe7   :  { %329 = vmatmul.mubr.f32.vlgmr.msra.gmra.mxu1 %v145_v53 }
 0x1a7   :  { %v330_v55 = vpop.f32.mrf.mxu1 }
 0x1a8   :  { %v240_v57 = vadd.f32 %v330_v55, %v147_v54 }
 0x1a9   :  { %v230_v58 = vpop.f32.mrf.mxu1 }
 0x1aa   :  { %242 = vst.msk [vmem:[#allocation2 + $0x8] sm:$0xff] %vm25_vm0, %v240_v57  ;;  %v239_v59 = vadd.f32 %v230_v58, %v146_v56 }
 0x1ac   :  { %241 = vst.msk [vmem:[#allocation2] sm:$0xff] %vm25_vm0, %v239_v59 }
 0x1b1   :  { %v247_v61 = vld [vmem:[#allocation2 + $0x8] sm:$0xff] }
 0x1b2   :  { %v256_v62 = vadd.f32 %v277_v60, %v247_v61 }
 0x1b3   :  { %v246_v63 = vld [vmem:[#allocation2] sm:$0xff] }
 0x1b4   :  { %v255_v0 = vadd.f32 %v277_v60, %v246_v63  ;;  %258 = vst.msk [vmem:[#allocation3 + $0x8] sm:$0xff] %vm25_vm0, %v256_v62 }
 0x1b6   :  { %257 = vst.msk [vmem:[#allocation3] sm:$0xff] %vm25_vm0, %v255_v0 }
 0x1b7   :  { %350 = shalt.err (!%p347_p4)
}
 0x1b8   :  { %s363_s0 = smov 128   ;;  %s364_s4 = smov 8  }
 0x1b9   :  { %270 = dma.vmem_to_hbm [thread:$0]  %s265_s20, 256, %s495_s5, [#allocation4], %s363_s0, %s363_s0, %s364_s4  }
 0x1ba   :  { %359 = dma.done.wait [#allocation4], 256  }
 0x1bb   :  { %360 = vsyncadd [#allocation4], 4294967040 }
 0x1bc   :  { %274 = vsyncpa [#allocation4], 1 }

</bundles_post_ra>
